<compile_context>
chip_gen: v6e
topology: v6e:2x2x1
jax: 0.10.0
libtpu: 0.0.40
codegen_flags: <defaults>
</compile_context>

<pallas_src>
import functools
import math

import jax
import jax.numpy as jnp
from jax.experimental import pallas as pl
from jax.experimental.pallas import tpu as pltpu


# ----------------------------------------------------------------------------
# Pallas kernel: one (batch*head, q-block) tile of attention.
# ----------------------------------------------------------------------------
def _sdpa_kernel(has_bias, return_scores, scale_ref, *refs):
    i = 0
    q_ref = refs[i]; i += 1           # (TQ, dk)
    k_ref = refs[i]; i += 1           # (dk, S)   -- VMEM-resident across q tiles
    v_ref = refs[i]; i += 1           # (S, dv)   -- VMEM-resident across q tiles
    bias_ref = None
    if has_bias:
        bias_ref = refs[i]; i += 1    # (TQ, S) additive bias (prev/masks folded)
    out_ref = refs[i]; i += 1         # (TQ, dv)
    attn_ref = refs[i]; i += 1        # (TQ, S)
    scores_ref = refs[i] if return_scores else None

    scale = scale_ref[0]

    q = q_ref[...]
    k = k_ref[...]
    v = v_ref[...]

    # scores = (q @ k) * scale  (+ bias), f32 accumulation on the MXU.
    s = jnp.dot(q, k, preferred_element_type=jnp.float32) * scale
    if has_bias:
        s = s + bias_ref[...].astype(jnp.float32)
    if return_scores:
        scores_ref[...] = s.astype(scores_ref.dtype)

    # numerically-stable softmax over the key axis (f32).
    m = jnp.max(s, axis=-1, keepdims=True)
    e = jnp.exp(s - m)
    denom = jnp.sum(e, axis=-1, keepdims=True)
    p = e / denom

    attn_ref[...] = p.astype(attn_ref.dtype)
    out_ref[...] = jnp.dot(p.astype(v.dtype), v,
                           preferred_element_type=jnp.float32).astype(out_ref.dtype)


# ----------------------------------------------------------------------------
# Wrapper: fold prev / masks into one additive bias, tile, call the kernel.
# ----------------------------------------------------------------------------
def scaled_dot_product_attention(q, k, v, scale, prev=None,
                                 key_padding_mask=None, attn_mask=None,
                                 res_attention=False, block_q=None):
    B, H, Lq, dk = q.shape
    S = k.shape[-1]
    dv = v.shape[-1]
    BH = B * H

    # ---- combine prev / attn_mask / key_padding_mask into one additive bias ----
    bias = None
    if prev is not None:
        bias = prev.astype(jnp.float32)
    if attn_mask is not None and attn_mask.dtype != jnp.bool_:
        am = attn_mask.astype(jnp.float32)
        am = am.reshape((1,) * (4 - am.ndim) + am.shape)
        bias = am if bias is None else bias + am
    neg_mask = None
    if attn_mask is not None and attn_mask.dtype == jnp.bool_:
        bm = attn_mask.reshape((1,) * (4 - attn_mask.ndim) + attn_mask.shape)
        neg_mask = jnp.broadcast_to(bm, (B, H, Lq, S))
    if key_padding_mask is not None:
        kpm = jnp.broadcast_to(key_padding_mask.reshape(B, 1, 1, S), (B, H, Lq, S))
        neg_mask = kpm if neg_mask is None else jnp.logical_or(neg_mask, kpm)
    if neg_mask is not None:
        base = (jnp.zeros((B, H, Lq, S), jnp.float32) if bias is None
                else jnp.broadcast_to(bias, (B, H, Lq, S)))
        bias = jnp.where(neg_mask, -jnp.inf, base)
    elif bias is not None:
        bias = jnp.broadcast_to(bias, (B, H, Lq, S))

    # ---- flatten (B, H) into one parallel grid axis ----
    q3 = q.reshape(BH, Lq, dk)
    k3 = k.reshape(BH, dk, S)
    v3 = v.reshape(BH, S, dv)
    bias3 = None if bias is None else bias.reshape(BH, Lq, S)
    scale_arr = jnp.asarray(scale, jnp.float32).reshape(1)

    # q-axis tile: full rows for small Lq, 128-row tiles otherwise.
    if block_q is None:
        block_q = 128 if (Lq > 128 and Lq % 128 == 0) else Lq
    assert Lq % block_q == 0
    grid = (BH, Lq // block_q)

    in_specs = [
        pl.BlockSpec(memory_space=pltpu.MemorySpace.SMEM),                   # scale
        pl.BlockSpec((None, block_q, dk), lambda bh, qi: (bh, qi, 0)),       # q tile
        pl.BlockSpec((None, dk, S), lambda bh, qi: (bh, 0, 0)),              # k (resident)
        pl.BlockSpec((None, S, dv), lambda bh, qi: (bh, 0, 0)),              # v (resident)
    ]
    args = [scale_arr, q3, k3, v3]
    if bias3 is not None:
        in_specs.append(pl.BlockSpec((None, block_q, S), lambda bh, qi: (bh, qi, 0)))
        args.append(bias3)

    out_shapes = [jax.ShapeDtypeStruct((BH, Lq, dv), q.dtype),
                  jax.ShapeDtypeStruct((BH, Lq, S), q.dtype)]
    out_specs = [pl.BlockSpec((None, block_q, dv), lambda bh, qi: (bh, qi, 0)),
                 pl.BlockSpec((None, block_q, S), lambda bh, qi: (bh, qi, 0))]
    if res_attention:
        out_shapes.append(jax.ShapeDtypeStruct((BH, Lq, S), jnp.float32))
        out_specs.append(pl.BlockSpec((None, block_q, S), lambda bh, qi: (bh, qi, 0)))

    itemsize = jnp.dtype(q.dtype).itemsize
    flops = 2 * BH * Lq * S * (dk + dv)
    transcendentals = BH * Lq * S
    bytes_accessed = itemsize * (q3.size + k3.size + v3.size
                                 + BH * Lq * dv
                                 + BH * Lq * S * (2 if res_attention else 1))
    if bias3 is not None:
        bytes_accessed += 4 * bias3.size

    outs = pl.pallas_call(
        functools.partial(_sdpa_kernel, bias3 is not None, res_attention),
        out_shape=tuple(out_shapes),
        grid=grid,
        in_specs=in_specs,
        out_specs=tuple(out_specs),
        compiler_params=pltpu.CompilerParams(
            dimension_semantics=("parallel", "parallel")),
        cost_estimate=pl.CostEstimate(flops=flops,
                                      transcendentals=transcendentals,
                                      bytes_accessed=bytes_accessed),
    )(*args)

    output = outs[0].reshape(B, H, Lq, dv)
    attn_weights = outs[1].reshape(B, H, Lq, S)
    if res_attention:
        attn_scores = outs[2].reshape(B, H, Lq, S)
        return output, attn_weights, attn_scores
    return output, attn_weights


# ----------------------------------------------------------------------------
# Plain-JAX reference (for correctness check only).
# ----------------------------------------------------------------------------
def _reference(q, k, v, scale, prev=None, key_padding_mask=None, attn_mask=None,
               res_attention=False):
    s = jnp.einsum("bhqd,bhds->bhqs", q, k) * scale
    if prev is not None:
        s = s + prev
    if attn_mask is not None:
        if attn_mask.dtype == jnp.bool_:
            s = jnp.where(attn_mask, -jnp.inf, s)
        else:
            s = s + attn_mask
    if key_padding_mask is not None:
        s = jnp.where(key_padding_mask[:, None, None, :], -jnp.inf, s)
    p = jax.nn.softmax(s, axis=-1)
    o = jnp.einsum("bhqs,bhsv->bhqv", p, v)
    return (o, p, s) if res_attention else (o, p)


if __name__ == "__main__":
    B, H = 2, 4
    d_model = 32
    dk = dv = d_model // H          # head_dim = 8
    Lq = S = 16
    scale = dk ** (-0.5)

    key = jax.random.PRNGKey(0)
    kq, kk, kv, kp = jax.random.split(key, 4)
    q = jax.random.normal(kq, (B, H, Lq, dk), jnp.float32)
    k = jax.random.normal(kk, (B, H, dk, S), jnp.float32)
    v = jax.random.normal(kv, (B, H, S, dv), jnp.float32)
    prev = 0.1 * jax.random.normal(kp, (B, H, Lq, S), jnp.float32)
    causal_mask = jnp.triu(jnp.ones((Lq, S), jnp.bool_), k=1)[None]   # (1, Lq, S)

    # plain path: (output, attn_weights)
    fwd = jax.jit(functools.partial(scaled_dot_product_attention, res_attention=False))
    out, attn = fwd(q, k, v, scale)
    jax.block_until_ready((out, attn))

    # residual-attention path with prev + bool attn_mask: (output, attn, scores)
    fwd_res = jax.jit(functools.partial(scaled_dot_product_attention, res_attention=True))
    out2, attn2, scores2 = fwd_res(q, k, v, scale, prev=prev, attn_mask=causal_mask)
    jax.block_until_ready((out2, attn2, scores2))

    # correctness vs plain-JAX reference
    ro, ra = _reference(q, k, v, scale)
    assert out.shape == (B, H, Lq, dv) and attn.shape == (B, H, Lq, S)
    assert jnp.allclose(out, ro, atol=1e-5, rtol=1e-5)
    assert jnp.allclose(attn, ra, atol=1e-5, rtol=1e-5)

    ro2, ra2, rs2 = _reference(q, k, v, scale, prev=prev, attn_mask=causal_mask,
                               res_attention=True)
    assert jnp.allclose(out2, ro2, atol=1e-5, rtol=1e-5)
    assert jnp.allclose(attn2, ra2, atol=1e-5, rtol=1e-5)
    finite = jnp.isfinite(rs2)
    assert bool(jnp.all(finite == jnp.isfinite(scores2)))
    assert jnp.allclose(jnp.where(finite, scores2, 0.0),
                        jnp.where(finite, rs2, 0.0), atol=1e-5, rtol=1e-5)

    print("KERNEL_OK")
</pallas_src>

<mosaic_0001>
module attributes {stable_mosaic.version = 11 : i64} {
  func.func @_sdpa_kernel(%arg0: i32, %arg1: i32, %arg2: memref<1xf32, #tpu.memory_space<smem>>, %arg3: memref<1x16x8xf32, #tpu.memory_space<vmem>>, %arg4: memref<1x8x16xf32, #tpu.memory_space<vmem>>, %arg5: memref<1x16x8xf32, #tpu.memory_space<vmem>>, %arg6: memref<1x16x8xf32, #tpu.memory_space<vmem>>, %arg7: memref<1x16x16xf32, #tpu.memory_space<vmem>>) attributes {dimension_semantics = [#tpu.dimension_semantics<parallel>, #tpu.dimension_semantics<parallel>], iteration_bounds = array<i64: 8, 1>, scalar_prefetch = 0 : i64, scratch_operands = 0 : i64, tpu.core_type = #tpu.core_type<tc>, window_params = [{transform_indices = @transform_0, window_bounds = array<i64: 1>}, {transform_indices = @transform_1, window_bounds = array<i64: 1, 16, 8>}, {transform_indices = @transform_2, window_bounds = array<i64: 1, 8, 16>}, {transform_indices = @transform_3, window_bounds = array<i64: 1, 16, 8>}, {transform_indices = @transform_4, window_bounds = array<i64: 1, 16, 8>}, {transform_indices = @transform_5, window_bounds = array<i64: 1, 16, 16>}]} {
    %c0 = arith.constant 0 : index
    %0 = memref.load %arg2[%c0] : memref<1xf32, #tpu.memory_space<smem>>
    %c0_0 = arith.constant 0 : index
    %c0_1 = arith.constant 0 : index
    %c0_2 = arith.constant 0 : index
    %1 = vector.load %arg3[%c0_0, %c0_1, %c0_2] : memref<1x16x8xf32, #tpu.memory_space<vmem>>, vector<1x16x8xf32>
    %2 = vector.shape_cast %1 : vector<1x16x8xf32> to vector<16x8xf32>
    %c0_3 = arith.constant 0 : index
    %c0_4 = arith.constant 0 : index
    %c0_5 = arith.constant 0 : index
    %3 = vector.load %arg4[%c0_3, %c0_4, %c0_5] : memref<1x8x16xf32, #tpu.memory_space<vmem>>, vector<1x8x16xf32>
    %4 = vector.shape_cast %3 : vector<1x8x16xf32> to vector<8x16xf32>
    %c0_6 = arith.constant 0 : index
    %c0_7 = arith.constant 0 : index
    %c0_8 = arith.constant 0 : index
    %5 = vector.load %arg5[%c0_6, %c0_7, %c0_8] : memref<1x16x8xf32, #tpu.memory_space<vmem>>, vector<1x16x8xf32>
    %6 = vector.shape_cast %5 : vector<1x16x8xf32> to vector<16x8xf32>
    %cst = arith.constant dense<0.000000e+00> : vector<16x16xf32>
    %7 = tpu.matmul %2, %4, %cst {dimension_numbers = #tpu.dot_dimension_numbers<[1], [0], [0], [1], [0, 0, 1, 1], [], []>} : vector<16x8xf32>, vector<8x16xf32>, vector<16x16xf32> -> vector<16x16xf32>
    %8 = vector.broadcast %0 : f32 to vector<16x16xf32>
    %9 = arith.mulf %7, %8 : vector<16x16xf32>
    %cst_9 = arith.constant dense<0xFF800000> : vector<16xf32>
    %10 = vector.multi_reduction <maximumf>, %9, %cst_9 [1] : vector<16x16xf32> to vector<16xf32>
    %11 = vector.shape_cast %10 : vector<16xf32> to vector<16x1xf32>
    %12 = vector.broadcast %11 : vector<16x1xf32> to vector<16x16xf32>
    %13 = arith.subf %9, %12 : vector<16x16xf32>
    %14 = math.exp %13 : vector<16x16xf32>
    %cst_10 = arith.constant dense<0.000000e+00> : vector<16xf32>
    %15 = vector.multi_reduction <add>, %14, %cst_10 [1] : vector<16x16xf32> to vector<16xf32>
    %16 = vector.shape_cast %15 : vector<16xf32> to vector<16x1xf32>
    %17 = vector.broadcast %16 : vector<16x1xf32> to vector<16x16xf32>
    %18 = arith.divf %14, %17 : vector<16x16xf32>
    %c0_11 = arith.constant 0 : index
    %c0_12 = arith.constant 0 : index
    %c0_13 = arith.constant 0 : index
    %19 = vector.load %arg7[%c0_11, %c0_12, %c0_13] : memref<1x16x16xf32, #tpu.memory_space<vmem>>, vector<1x16x16xf32>
    %20 = vector.shape_cast %19 : vector<1x16x16xf32> to vector<16x16xf32>
    %21 = vector.shape_cast %18 : vector<16x16xf32> to vector<1x16x16xf32>
    tpu.vector_store %arg7[%c0_11, %c0_12, %c0_13], %21 {strides = array<i32>} : memref<1x16x16xf32, #tpu.memory_space<vmem>>, vector<1x16x16xf32>,
    %cst_14 = arith.constant dense<0.000000e+00> : vector<16x8xf32>
    %22 = tpu.matmul %18, %6, %cst_14 {dimension_numbers = #tpu.dot_dimension_numbers<[1], [0], [0], [1], [0, 0, 1, 1], [], []>} : vector<16x16xf32>, vector<16x8xf32>, vector<16x8xf32> -> vector<16x8xf32>
    %c0_15 = arith.constant 0 : index
    %c0_16 = arith.constant 0 : index
    %c0_17 = arith.constant 0 : index
    %23 = vector.load %arg6[%c0_15, %c0_16, %c0_17] : memref<1x16x8xf32, #tpu.memory_space<vmem>>, vector<1x16x8xf32>
    %24 = vector.shape_cast %23 : vector<1x16x8xf32> to vector<16x8xf32>
    %25 = vector.shape_cast %22 : vector<16x8xf32> to vector<1x16x8xf32>
    tpu.vector_store %arg6[%c0_15, %c0_16, %c0_17], %25 {strides = array<i32>} : memref<1x16x8xf32, #tpu.memory_space<vmem>>, vector<1x16x8xf32>,
    return
  }
  func.func @transform_0(%arg0: i32, %arg1: i32) -> i32 {
    %c0_i32 = arith.constant 0 : i32
    %c0_i32_0 = arith.constant 0 : i32
    return %c0_i32 : i32
  }
  func.func @transform_1(%arg0: i32, %arg1: i32) -> (i32, i32, i32) {
    %c0_i32 = arith.constant 0 : i32
    %c0_i32_0 = arith.constant 0 : i32
    return %arg0, %arg1, %c0_i32 : i32, i32, i32
  }
  func.func @transform_2(%arg0: i32, %arg1: i32) -> (i32, i32, i32) {
    %c0_i32 = arith.constant 0 : i32
    %c0_i32_0 = arith.constant 0 : i32
    %c0_i32_1 = arith.constant 0 : i32
    return %arg0, %c0_i32, %c0_i32_0 : i32, i32, i32
  }
  func.func @transform_3(%arg0: i32, %arg1: i32) -> (i32, i32, i32) {
    %c0_i32 = arith.constant 0 : i32
    %c0_i32_0 = arith.constant 0 : i32
    %c0_i32_1 = arith.constant 0 : i32
    return %arg0, %c0_i32, %c0_i32_0 : i32, i32, i32
  }
  func.func @transform_4(%arg0: i32, %arg1: i32) -> (i32, i32, i32) {
    %c0_i32 = arith.constant 0 : i32
    %c0_i32_0 = arith.constant 0 : i32
    return %arg0, %arg1, %c0_i32 : i32, i32, i32
  }
  func.func @transform_5(%arg0: i32, %arg1: i32) -> (i32, i32, i32) {
    %c0_i32 = arith.constant 0 : i32
    %c0_i32_0 = arith.constant 0 : i32
    return %arg0, %arg1, %c0_i32 : i32, i32, i32
  }
}

</mosaic_0001>

<bundles_post_ra>
// kernel: scaled_dot_product_attention.1
= control target key start
LH: loop header
LB: loop body
LE: loop exit
PB: predicated region body
PF: predicated region fallthrough
CT: control target
= control target key end

     0   :  { %s1048_s0 = inlined_call_operand.<no memory space> [shape: f32[1], index: 0, kind: input, shape index: {}]   ;;  %s1049_s1 = inlined_call_operand.vmem [shape: f32[8,16,8], index: 1, kind: input, shape index: {}]   ;;  %s1050_s2 = inlined_call_operand.vmem [shape: f32[8,8,16], index: 2, kind: input, shape index: {}]   ;;  %s1051_s3 = inlined_call_operand.vmem [shape: f32[8,16,8], index: 3, kind: input, shape index: {}]   ;;  %s1052_s4 = inlined_call_operand.vmem [shape: f32[8,16,8], index: 4, kind: output, shape index: {0}]   ;;  %s1053_s5 = inlined_call_operand.hbm [shape: f32[8,16,16], index: 5, kind: output, shape index: {1}]  }
   0x1   :  { %11 = sst [smem:[#allocation2]] %s1048_s0 }
   0x2   :  { %12 = vsyncpa [#allocation4], 0 }
   0x3   :  { %14 = vsyncpa [#allocation4 + $0x1], 0  ;;  %s908_s20 = smov 0   ;;  %s910_s21 = smov 0  }
   0x4   :  { %s912_s22 = smov 0   ;;  %s914_s23 = smov 0  }
   0x5   :  { %s916_s24 = smov 0   ;;  %s918_s25 = smov 0  }
   0x6 LB: > { %s684_s0 = sadd.s32 4294967295, %s870_s25   ;;  %s685_s26 = sadd.s32 4294967294, %s870_s25   ;;  %s870_s25 = sphi %s918_s25, %s20_s25   ;;  %s866_s24 = sphi %s916_s24, %s1060_s24   ;;  %s862_s23 = sphi %s914_s23, %s1059_s23   ;;  %s858_s22 = sphi %s912_s22, %s1058_s22   ;;  %s854_s21 = sphi %s910_s21, %s1057_s21   ;;  %s850_s20 = sphi %s908_s20, %s1056_s20  }
   0x7   : > { %s32_s27 = sadd.s32 1, %s866_s24  ;;  %s170_s28 = sadd.s32 1, %s858_s22 }
   0x8   : > { %p34_p0 = scmp.ge.s32.totalorder %s32_s27, 8  ;;  %p180_p1 = scmp.ne.s32.totalorder %s858_s22, %s854_s21 }
   0x9   : > { %p181_p2 = scmp.eq.s32.totalorder %s684_s0, 7  ;;  %p186_p3 = scmp.ne.s32.totalorder %s854_s21, %s850_s20 }
   0xa   : > { %s1062_s27 = smov (%p34_p0, %s32_s27), 0  ;;  %p187_p5 = scmp.eq.s32.totalorder %s685_s26, 7 }
   0xb   : > { %p948_p4 = por %p181_p2, %p180_p1  ;;  %s165_s30 = ssub.s32 %s866_s24, %s1062_s27 }
   0xc   : > { %p688_p6 = scmp.ge.s32.totalorder %s870_s25, 1  ;;  %p168_p7 = scmp.eq.s32.totalorder %s165_s30, 0 }
   0xd   : > { %p955_p8 = por %p187_p5, %p186_p3  ;;  %p236_p9 = scmp.lt.s32.totalorder %s870_s25, 9 }
   0xe   : > { %s961_s7 = scalar_select %p168_p7, %s858_s22, %s170_s28  }
   0xf   : > { %p237_p10 = pnand %p688_p6, %p236_p9 }
  0x10   : > { %p287_p11 = scmp.lt.s32.totalorder (!%p237_p10), %s862_s23, 7  ;;  %s316_s17 = sld [smem:[#allocation2]] (!%p237_p10) }
  0x11   : > { %240 = sbr.rel (%p237_p10) target bundleno = 738 (0x2e2), region = 36  ;;  %s283_s26 = sand.u32 (!%p237_p10), 1, %s854_s21  }
  0x12   : > { %s689_s28 = sshll.u32 (!%p237_p10), %s283_s26, 4  ;;  %s997_s14 = scalar_lea.sflag (!%p237_p10), [#allocation4], %s283_s26 }
  0x13   : > { %s285_s30 = scalar_lea.vmem (!%p237_p10), [#allocation3], %s689_s28 }
  0x16   : > { %s288_s8 = scalar_select %p287_p11, %s862_s23, 7  ;;  %vm322_vm0 = vcmask 64512   ;;  %v404_v4 = vstv %s316_s17  ;;  %vm407_vm1 = vcmask 130048  }
  0x18   : > { %s692_s9 = sshll.u32 %s288_s8, 3  ;;  %s965_s10 = sshll.u32 %s288_s8, 4 }
  0x19   : > { %s299_s13 = scalar_lea.vmem %s1050_s2, %s692_s9  ;;  %s294_s16 = scalar_lea.vmem %s1049_s1, %s965_s10 }
  0x1a   : > { %v319_v0 = vld [vmem:[%s299_s13] sm:$0xff]  ;;  %v318_v2 = vld [vmem:[%s294_s16 + $0x8] sm:$0xff]  ;;  %s304_s0 = scalar_lea.vmem %s1051_s3, %s965_s10  ;;  %s544_s8 = sshll.u32 %s285_s30, 4  ;;  %s989_s8 = int_to_ptr.vmem [resolvable:$true] %s544_s8 }
  0x1b   : > { %v317_v1 = vld [vmem:[%s294_s16] sm:$0xff]  ;;  %717 = vmatprep.subr.mxu0 %v319_v0  ;;  %v321_v20 = vld [vmem:[%s304_s0 + $0x8] sm:$0xff]  ;;  %s709_s9 = sshll.u32 %s862_s23, 8  ;;  %s794_s15 = scalar_lea.vmem %s989_s8, 256 }
  0x1c   : > { %719 = vmatprep.mubr.msk.f32.mxu0 %vm322_vm0, %v317_v1  ;;  %718 = vmatpush3.msra.mxu0 %v319_v0  ;;  %v320_v21 = vld [vmem:[%s304_s0] sm:$0xff]  ;;  %s995_s13 = scalar_lea.hbm %s1053_s5, %s709_s9  ;;  %p795_p12 = scmp.ne.s32.totalorder %s989_s8, %s794_s15 }
  0x1d   : > { %720 = vmatmul.mubr.msk.f32.vlgmr.msra.gmra.mxu0 %vm322_vm0, %v318_v2  ;;  %722 = vmatprep.subr.mxu1 %v321_v20  ;;  %s872_s16 = smov [#allocation3]  }
  0x1e   : > { %723 = vmatpush3.msra.mxu1 %v321_v20  ;;  %p796_p13 = pnand %p795_p12, %p948_p4  ;;  %s798_s17 = sshll.u32 %s872_s16, 4  ;;  %s799_s17 = int_to_ptr.vmem [resolvable:$false] %s798_s17 }
  0x1f   : > { %724 = vmatprep.subr.mxu1 %v320_v21  ;;  %s800_s18 = scalar_lea.vmem %s799_s17, 512  ;;  %p801_p1 = scmp.lt.s32.totalorder %s989_s8, %s799_s17 }
  0x20   : > { %725 = vmatpush3.msra.mxu1 %v320_v21  ;;  %p797_p0 = pneg %p796_p13  ;;  %p802_p2 = scmp.lt.s32.totalorder %s800_s18, %s794_s15 }
  0x22   : > { %p803_p3 = por %p802_p2, %p801_p1 }
  0x24   : > { %p804_p5 = pnand %p803_p3, %p797_p0 }
  0xdd   : > { %v721_v3 = vpop.f32.mrf.mxu0 }
  0xde   : > { %v406_v7 = vmul.f32 %v721_v3, %v404_v4 }
  0xdf   : > { %v395_v5 = vpop.f32.mrf.mxu0 }
  0xe0   : > { %v405_v6 = vmul.f32 %v404_v4, %v395_v5  ;;  %v411_v9 = vsel %vm407_vm1, %v406_v7, -inf }
  0xe2   : > { %v408_v8 = vsel %vm407_vm1, %v405_v6, -inf }
  0xe3   : > { %409 = vmax.xlane.f32.xlu0 %v408_v8 }
  0xe7   : > { %412 = vmax.xlane.f32.xlu0 %v411_v9 }
 0x16c   : > { %v410_v10 = vpop.xlane.xlu0 %409 }
 0x16d   : > { %v414_v11 = vsub.f32 %v405_v6, %v410_v10 }
 0x16f   : > { %v416_v12 = vmul.f32 1.442695, %v414_v11 }
 0x170   : > { %v413_v13 = vpop.xlane.xlu0 %412 }
 0x171   : > { %786 = vpow2.f32 %v416_v12  ;;  %v415_v14 = vsub.f32 %v406_v7, %v413_v13 }
 0x173   : > { %v418_v15 = vmul.f32 1.442695, %v415_v14 }
 0x175   : > { %788 = vpow2.f32 %v418_v15 }
 0x17e   : > { %v787_v16 = vpop.eup %786 }
 0x17f   : > { %v420_v17 = vsel %vm407_vm1, %v787_v16, 0.0 }
 0x180   : > { %421 = vadd.xlane.f32.xlu1 %v420_v17 }
 0x182   : > { %v789_v18 = vpop.eup %788 }
 0x183   : > { %v423_v19 = vsel %vm407_vm1, %v789_v18, 0.0 }
 0x184   : > { %424 = vadd.xlane.f32.xlu1 %v423_v19 }
 0x209   : > { %v422_v22 = vpop.xlane.xlu1 %421 }
 0x20a   : > { %790 = vrcp.f32 %v422_v22 }
 0x20d   : > { %v425_v23 = vpop.xlane.xlu1 %424 }
 0x20e   : > { %792 = vrcp.f32 %v425_v23 }
 0x217   : > { %v791_v24 = vpop.eup %790 }
 0x218   : > { %v427_v25 = vmul.f32 %v791_v24, %v787_v16 }
 0x21a   : > { %430 = vst.msk [vmem:[%s285_s30] sm:$0xff] %vm407_vm1, %v427_v25  ;;  %726 = vmatprep.mubr.msk.f32.mxu1 %vm407_vm1, %v427_v25 }
 0x21b   : > { %v793_v26 = vpop.eup %792 }
 0x21c   : > { %v429_v27 = vmul.f32 %v793_v26, %v789_v18 }
 0x21e   : > { %727 = vmatmul.mubr.msk.f32.vlgmr.msra.gmra.mxu1 %vm407_vm1, %v429_v27  ;;  %431 = vst.msk [vmem:[%s285_s30 + $0x8] sm:$0xff] %vm407_vm1, %v429_v27 }
 0x21f   : > { %807 = shalt.err (!%p804_p5)
}
 0x220   : > { %s808_s23 = scalar_lea.hbm %s995_s13, 256  ;;  %s812_s26 = scalar_lea.hbm %s1053_s5, 2048 }
 0x221   : > { %p809_p6 = scmp.ne.s32.totalorder %s995_s13, %s808_s23  ;;  %p813_p10 = scmp.lt.s32.totalorder %s995_s13, %s1053_s5 }
 0x222   : > { %p814_p11 = scmp.lt.s32.totalorder %s812_s26, %s808_s23 }
 0x223   : > { %p810_p7 = pnand %p809_p6, %p948_p4 }
 0x224   : > { %p815_p12 = por %p814_p11, %p813_p10 }
 0x225   : > { %p811_p9 = pneg %p810_p7 }
 0x227   : > { %p816_p13 = pnand %p815_p12, %p811_p9 }
 0x229   : > { %819 = shalt.err (!%p816_p13)
}
 0x22a   : > { %s873_s9 = smov 128   ;;  %s874_s11 = smov 8  }
 0x22b   : > { %729 = dma.vmem_to_hbm [thread:$0]  (%p948_p4), %s989_s8, 256, %s995_s13, %s997_s14, %s873_s9, %s873_s9, %s874_s11  }
 0x22c   : > { %s313_s16 = scalar_lea.vmem %s1052_s4, %s965_s10 }
 0x2de   : > { %v728_v28 = vpop.f32.mrf.mxu1 }
 0x2df   : > { %514 = vst.msk [vmem:[%s313_s16 + $0x8] sm:$0xff] %vm322_vm0, %v728_v28 }
 0x2e0   : > { %v504_v29 = vpop.f32.mrf.mxu1 }
 0x2e1   : > { %513 = vst.msk [vmem:[%s313_s16] sm:$0xff] %vm322_vm0, %v504_v29 }
 0x2e2 PF: > { %p735_p0 = scmp.ge.s32.totalorder %s870_s25, 2  ;;  %s571_s17 = sand.u32 1, %s850_s20  }
 0x2e3   : > { %s572_s29 = scalar_lea.sflag [#allocation4], %s571_s17 }
 0x2e4   : > { %p732_p1 = pnand %p735_p0, %p955_p8 }
 0x2e6   : > { %p733_p2 = pneg %p732_p1 }
 0x2e8   : > { %845 = dma.done.wait (%p733_p2), %s572_s29, 256  }
 0x2e9   : > { %847 = vsyncadd (%p733_p2), %s572_s29, 4294967040  ;;  %s20_s25 = sadd.s32 1, %s870_s25   ;;  %s1056_s20 = smov %s854_s21 }
 0x2ea   : > { %p17_p4 = scmp.ge.s32.totalorder %s20_s25, 10   ;;  %s1057_s21 = smov %s858_s22 }
 0x2eb   : > { %s1058_s22 = smov %s961_s7  ;;  %s1059_s23 = smov %s866_s24 }
 0x2ec   : > { %s1060_s24 = smov %s1062_s27  ;;  %19 = sbr.rel (!%p17_p4) target bundleno = 6 (0x6), region = 89 }
 0x2f1   :  { %577 = vsyncpa [#allocation4], 1 }
 0x2f2   :  { %579 = vsyncpa [#allocation4 + $0x1], 1 }

</bundles_post_ra>
